<compile_context>
chip_gen: v5e
topology: v5e:2x2
jax: 0.10.0
libtpu: 0.0.40
codegen_flags: <defaults>
</compile_context>

<pallas_src>
import functools

import jax
import jax.numpy as jnp
from jax.experimental import pallas as pl
from jax.experimental.pallas import tpu as pltpu

LANE = 128
SUBLANE = 8
ROWS_PER_STEP = 512        # target rows per grid step (v5e/v6e; halve for v7x)
PALLAS_MIN_ROWS = 1024     # below this, XLA fusion beats kernel launch overhead


def _round_up(n, m):
    return ((n + m - 1) // m) * m


# ----------------------------- fused Pallas kernel -----------------------------

def _fused_forward_kernel(x_ref,       # (rows, Kp)  dialogue features
                          ids_ref,     # (rows, 1)   int32 token ids
                          di_w_ref,    # (Kp, Lp)
                          pr_w_ref,    # (Lp, Hp)
                          emb_ref,     # (Vp, Hp)    token embedding table
                          fc_w_ref,    # (Hp, Np)
                          bias_ref,    # (8, LANE)   rows 0/1/2 = di_b/pr_b/fc_b
                          out_ref,     # (nb, Np)    fc output, CLS rows only
                          *, rows, t_pad, nb, vp):
    di_b = bias_ref[0:1, :]
    pr_b = bias_ref[1:2, :]
    fc_b = bias_ref[2:3, :]

    # --- DialogueInfer stand-in: per-token dense + tanh (MXU + EUP) ---
    # TODO(synk): real DialogueInfer is an LSTM recurrence; module is external.
    h = jnp.tanh(
        jnp.dot(x_ref[...], di_w_ref[...], preferred_element_type=jnp.float32)
        + di_b)

    # --- project: stream_embedding = Linear(lstm_hidden -> hidden) ---
    stream = (jnp.dot(h, pr_w_ref[...], preferred_element_type=jnp.float32)
              + pr_b)

    # --- token-embedding gather as a one-hot MXU matmul (no per-row stores) ---
    ids = ids_ref[...]                                              # (rows, 1)
    vocab_iota = jax.lax.broadcasted_iota(jnp.int32, (rows, vp), 1)
    onehot = (vocab_iota == ids).astype(jnp.float32)                # (rows, Vp)
    tok = jnp.dot(onehot, emb_ref[...], preferred_element_type=jnp.float32)

    # --- over_write_embedding_forward: token emb + additional (stream) emb ---
    hidden = tok + stream
    # TODO(synk): EIRoberta transformer stack is an external module; identity.

    # --- feature = last_hidden[:, 0, :]: pick the CLS row of every sequence
    #     in this tile via a tiny selection-matrix matmul (nb x rows) ---
    col = jax.lax.broadcasted_iota(jnp.int32, (nb, rows), 1)
    cls_row = jax.lax.broadcasted_iota(jnp.int32, (nb, rows), 0) * t_pad
    sel = (col == cls_row).astype(jnp.float32)                      # (nb, rows)
    feature = jnp.dot(sel, hidden, preferred_element_type=jnp.float32)

    # --- fc head on CLS rows only (fc_dropout = identity at eval) ---
    out_ref[...] = (
        jnp.dot(feature, fc_w_ref[...], preferred_element_type=jnp.float32)
        + fc_b).astype(out_ref.dtype)


@functools.partial(jax.jit, static_argnames=("nb", "t_pad"))
def _fused_forward(x2d, ids2d, di_w, pr_w, emb, fc_w, bias, *, nb, t_pad):
    m_pad, kp = x2d.shape
    lp = di_w.shape[1]
    hp = pr_w.shape[1]
    np_ = fc_w.shape[1]
    vp = emb.shape[0]
    rows = nb * t_pad
    b_pad = m_pad // t_pad

    kernel = functools.partial(
        _fused_forward_kernel, rows=rows, t_pad=t_pad, nb=nb, vp=vp)
    const = lambda i: (0, 0)

    return pl.pallas_call(
        kernel,
        out_shape=jax.ShapeDtypeStruct((b_pad, np_), jnp.float32),
        grid=(b_pad // nb,),
        in_specs=[
            pl.BlockSpec((rows, kp), lambda i: (i, 0)),   # x rows
            pl.BlockSpec((rows, 1), lambda i: (i, 0)),    # token ids
            pl.BlockSpec((kp, lp), const),                # di_w
            pl.BlockSpec((lp, hp), const),                # proj_w
            pl.BlockSpec((vp, hp), const),                # emb table (toy vocab)
            pl.BlockSpec((hp, np_), const),               # fc_w
            pl.BlockSpec(bias.shape, const),              # packed biases
        ],
        out_specs=pl.BlockSpec((nb, np_), lambda i: (i, 0)),
        compiler_params=pltpu.CompilerParams(
            # Shards batch tiles over v7x's 2 TCs once the grid has >1 step;
            # measured no-op on single-core v5e/v6e.
            dimension_semantics=("parallel",)),
    )(x2d, ids2d, di_w, pr_w, emb, fc_w, bias)


# ----------------------------- model wrapper ------------------------------

class Config:
    input_size = 32          # DialogueInfer input feature size
    lstm_hidden_size = 32    # DialogueInfer output size
    hidden_size = 32         # RoBERTa hidden size
    target_size = 4          # classification head
    fc_dropout = 0.1         # identity at inference
    vocab_size = 100


def init_params(cfg, key):
    """Synthetic parameters stored zero-padded to 128-lane-dense shapes.
    fc follows _init_weights (normal(0, 0.1) weight, zero bias); the other
    linears get small random weights/biases so the bias path is exercised."""
    ks = jax.random.split(key, 6)
    kp = _round_up(cfg.input_size, LANE)
    lp = _round_up(cfg.lstm_hidden_size, LANE)
    hp = _round_up(cfg.hidden_size, LANE)
    np_ = _round_up(cfg.target_size, LANE)
    vp = _round_up(cfg.vocab_size, LANE)

    def pad2(a, r, c):
        return jnp.pad(a, ((0, r - a.shape[0]), (0, c - a.shape[1])))

    p = {}
    # DialogueInfer stand-in weights (real module is an external LSTM).
    di_w = 0.1 * jax.random.normal(ks[0], (cfg.input_size, cfg.lstm_hidden_size), jnp.float32)
    di_b = 0.1 * jax.random.normal(ks[1], (cfg.lstm_hidden_size,), jnp.float32)
    p["di_w"] = pad2(di_w, kp, lp)
    # project: Linear(lstm_hidden_size -> hidden_size)
    pr_w = 0.1 * jax.random.normal(ks[2], (cfg.lstm_hidden_size, cfg.hidden_size), jnp.float32)
    pr_b = 0.1 * jax.random.normal(ks[3], (cfg.hidden_size,), jnp.float32)
    p["proj_w"] = pad2(pr_w, lp, hp)
    # EIRoberta word embeddings (padding_idx 0 zeroed per _init_weights).
    # Padded id rows are 0 and land on this zero row, so padded outputs stay
    # benign (they are also sliced off in the wrapper).
    emb = 0.1 * jax.random.normal(ks[4], (cfg.vocab_size, cfg.hidden_size), jnp.float32)
    emb = emb.at[0].set(0.0)
    p["emb"] = pad2(emb, vp, hp)
    # fc: Linear(hidden_size -> target_size), normal(0, 0.1) weight, zero bias.
    fc_w = 0.1 * jax.random.normal(ks[5], (cfg.hidden_size, cfg.target_size), jnp.float32)
    p["fc_w"] = pad2(fc_w, hp, np_)
    # Pack the three biases into a single (8, 128) block (one DMA descriptor
    # instead of three tiny ones). Row 2 (fc bias) stays zero per _init_weights.
    bias = jnp.zeros((SUBLANE, LANE), jnp.float32)
    bias = bias.at[0, :cfg.lstm_hidden_size].set(di_b)
    bias = bias.at[1, :cfg.hidden_size].set(pr_b)
    p["bias"] = bias
    return p


def reference_forward(params, inputs, cfg):
    """Pure-JAX reference (also the tiny-M fast path) on un-padded slices."""
    x1 = inputs["inputs1"]["x"]
    ids = inputs["inputs2"]["input_ids"]
    di_w = params["di_w"][:cfg.input_size, :cfg.lstm_hidden_size]
    di_b = params["bias"][0, :cfg.lstm_hidden_size]
    pr_w = params["proj_w"][:cfg.lstm_hidden_size, :cfg.hidden_size]
    pr_b = params["bias"][1, :cfg.hidden_size]
    emb = params["emb"][:cfg.vocab_size, :cfg.hidden_size]
    fc_w = params["fc_w"][:cfg.hidden_size, :cfg.target_size]
    fc_b = params["bias"][2, :cfg.target_size]
    h = jnp.tanh(x1 @ di_w + di_b)                 # DialogueInfer stand-in
    stream = h @ pr_w + pr_b                       # project
    tok = jnp.take(emb, ids, axis=0)               # word embeddings
    hidden = tok + stream                          # over_write_embedding_forward
    feature = hidden[:, 0, :]                      # CLS token
    return feature @ fc_w + fc_b                   # fc head


def base_model_forward(params, inputs, cfg, use_pallas=None):
    x1 = inputs["inputs1"]["x"]                   # (B, T, input_size)
    input_ids = inputs["inputs2"]["input_ids"]    # (B, T)
    B, T, K = x1.shape
    M = B * T

    if use_pallas is None:
        # Pure-XLA fast path for tiny problems: a single grid step of a few
        # hundred FLOPs cannot amortize pallas_call launch + pipeline setup.
        use_pallas = M >= PALLAS_MIN_ROWS
    if not use_pallas:
        return reference_forward(params, inputs, cfg)

    kp = _round_up(cfg.input_size, LANE)
    t_pad = _round_up(T, SUBLANE)

    # Batch tile: nb sequences per grid step, targeting ~ROWS_PER_STEP rows.
    # TODO(synk): halve ROWS_PER_STEP for v7x's 32 MiB scoped VMEM (or raise
    # vmem_limit_bytes) at production hidden sizes.
    nb_cap = max(SUBLANE, (ROWS_PER_STEP // t_pad) // SUBLANE * SUBLANE)
    nb = min(_round_up(B, SUBLANE), nb_cap)
    b_pad = _round_up(B, nb)

    x3d = jnp.pad(x1.astype(jnp.float32),
                  ((0, b_pad - B), (0, t_pad - T), (0, kp - K)))
    x2d = x3d.reshape(b_pad * t_pad, kp)
    ids = jnp.pad(input_ids.astype(jnp.int32),
                  ((0, b_pad - B), (0, t_pad - T)))
    ids2d = ids.reshape(b_pad * t_pad, 1)

    out_pad = _fused_forward(x2d, ids2d,
                             params["di_w"], params["proj_w"], params["emb"],
                             params["fc_w"], params["bias"],
                             nb=nb, t_pad=t_pad)

    # Kernel already selected CLS rows; just drop batch / lane padding.
    return out_pad[:B, :cfg.target_size]


# --------------------------------- main ------------------------------------

if __name__ == "__main__":
    cfg = Config()
    key = jax.random.PRNGKey(0)
    kparams, k1, k2, k3, k4 = jax.random.split(key, 5)
    params = init_params(cfg, kparams)

    # --- small shape (B=2, T=8): force the Pallas path so the kernel runs ---
    B, T = 2, 8
    x1 = jax.random.normal(k1, (B, T, cfg.input_size), jnp.float32)
    input_ids = jax.random.randint(k2, (B, T), 1, cfg.vocab_size, jnp.int32)
    inputs = {"inputs1": {"x": x1}, "inputs2": {"input_ids": input_ids}}

    out = base_model_forward(params, inputs, cfg, use_pallas=True)
    out = jax.block_until_ready(out)
    assert out.shape == (B, cfg.target_size)
    ref = reference_forward(params, inputs, cfg)
    assert jnp.allclose(out, ref, atol=2e-2, rtol=2e-2), (out, ref)

    # --- larger batch: exercises a multi-step grid via the auto dispatch ---
    B2 = 128
    x1b = jax.random.normal(k3, (B2, T, cfg.input_size), jnp.float32)
    idsb = jax.random.randint(k4, (B2, T), 1, cfg.vocab_size, jnp.int32)
    inputs_b = {"inputs1": {"x": x1b}, "inputs2": {"input_ids": idsb}}

    out_b = base_model_forward(params, inputs_b, cfg)   # auto: M=1024 -> Pallas
    out_b = jax.block_until_ready(out_b)
    assert out_b.shape == (B2, cfg.target_size)
    ref_b = reference_forward(params, inputs_b, cfg)
    assert jnp.allclose(out_b, ref_b, atol=2e-2, rtol=2e-2)

    print("KERNEL_OK")
</pallas_src>

<mosaic_0001>
module attributes {stable_mosaic.version = 11 : i64} {
  func.func @_fused_forward_kernel(%arg0: i32, %arg1: memref<64x128xf32, #tpu.memory_space<vmem>>, %arg2: memref<64x1xi32, #tpu.memory_space<vmem>>, %arg3: memref<128x128xf32, #tpu.memory_space<vmem>>, %arg4: memref<128x128xf32, #tpu.memory_space<vmem>>, %arg5: memref<128x128xf32, #tpu.memory_space<vmem>>, %arg6: memref<128x128xf32, #tpu.memory_space<vmem>>, %arg7: memref<8x128xf32, #tpu.memory_space<vmem>>, %arg8: memref<8x128xf32, #tpu.memory_space<vmem>>) attributes {dimension_semantics = [#tpu.dimension_semantics<parallel>], iteration_bounds = array<i64: 1>, scalar_prefetch = 0 : i64, scratch_operands = 0 : i64, tpu.core_type = #tpu.core_type<tc>, window_params = [{transform_indices = @transform_0, window_bounds = array<i64: 64, 128>}, {transform_indices = @transform_1, window_bounds = array<i64: 64, 1>}, {pipeline_mode = #tpu.pipeline_mode<synchronous>, transform_indices = @transform_2, window_bounds = array<i64: 128, 128>}, {pipeline_mode = #tpu.pipeline_mode<synchronous>, transform_indices = @transform_3, window_bounds = array<i64: 128, 128>}, {pipeline_mode = #tpu.pipeline_mode<synchronous>, transform_indices = @transform_4, window_bounds = array<i64: 128, 128>}, {pipeline_mode = #tpu.pipeline_mode<synchronous>, transform_indices = @transform_5, window_bounds = array<i64: 128, 128>}, {pipeline_mode = #tpu.pipeline_mode<synchronous>, transform_indices = @transform_6, window_bounds = array<i64: 8, 128>}, {transform_indices = @transform_7, window_bounds = array<i64: 8, 128>}]} {
    %c0 = arith.constant 0 : index
    %c0_0 = arith.constant 0 : index
    %0 = vector.load %arg7[%c0, %c0_0] : memref<8x128xf32, #tpu.memory_space<vmem>>, vector<1x128xf32>
    %c1 = arith.constant 1 : index
    %c0_1 = arith.constant 0 : index
    %1 = vector.load %arg7[%c1, %c0_1] : memref<8x128xf32, #tpu.memory_space<vmem>>, vector<1x128xf32>
    %c2 = arith.constant 2 : index
    %c0_2 = arith.constant 0 : index
    %2 = vector.load %arg7[%c2, %c0_2] : memref<8x128xf32, #tpu.memory_space<vmem>>, vector<1x128xf32>
    %c0_3 = arith.constant 0 : index
    %c0_4 = arith.constant 0 : index
    %3 = vector.load %arg1[%c0_3, %c0_4] : memref<64x128xf32, #tpu.memory_space<vmem>>, vector<64x128xf32>
    %c0_5 = arith.constant 0 : index
    %c0_6 = arith.constant 0 : index
    %4 = vector.load %arg3[%c0_5, %c0_6] : memref<128x128xf32, #tpu.memory_space<vmem>>, vector<128x128xf32>
    %cst = arith.constant dense<0.000000e+00> : vector<64x128xf32>
    %5 = tpu.matmul %3, %4, %cst {dimension_numbers = #tpu.dot_dimension_numbers<[1], [0], [0], [1], [0, 0, 1, 1], [], []>} : vector<64x128xf32>, vector<128x128xf32>, vector<64x128xf32> -> vector<64x128xf32>
    %6 = vector.broadcast %0 : vector<1x128xf32> to vector<64x128xf32>
    %7 = arith.addf %5, %6 : vector<64x128xf32>
    %8 = math.tanh %7 : vector<64x128xf32>
    %c0_7 = arith.constant 0 : index
    %c0_8 = arith.constant 0 : index
    %9 = vector.load %arg4[%c0_7, %c0_8] : memref<128x128xf32, #tpu.memory_space<vmem>>, vector<128x128xf32>
    %cst_9 = arith.constant dense<0.000000e+00> : vector<64x128xf32>
    %10 = tpu.matmul %8, %9, %cst_9 {dimension_numbers = #tpu.dot_dimension_numbers<[1], [0], [0], [1], [0, 0, 1, 1], [], []>} : vector<64x128xf32>, vector<128x128xf32>, vector<64x128xf32> -> vector<64x128xf32>
    %11 = vector.broadcast %1 : vector<1x128xf32> to vector<64x128xf32>
    %12 = arith.addf %10, %11 : vector<64x128xf32>
    %c0_10 = arith.constant 0 : index
    %c0_11 = arith.constant 0 : index
    %13 = vector.load %arg2[%c0_10, %c0_11] : memref<64x1xi32, #tpu.memory_space<vmem>>, vector<64x1xi32>
    %14 = tpu.iota {dimensions = array<i32: 1>} : vector<64x128xi32>
    %15 = vector.broadcast %13 : vector<64x1xi32> to vector<64x128xi32>
    %16 = arith.cmpi eq, %14, %15 : vector<64x128xi32>
    %17 = arith.extui %16 : vector<64x128xi1> to vector<64x128xi32>
    %18 = arith.sitofp %17 : vector<64x128xi32> to vector<64x128xf32>
    %c0_12 = arith.constant 0 : index
    %c0_13 = arith.constant 0 : index
    %19 = vector.load %arg5[%c0_12, %c0_13] : memref<128x128xf32, #tpu.memory_space<vmem>>, vector<128x128xf32>
    %cst_14 = arith.constant dense<0.000000e+00> : vector<64x128xf32>
    %20 = tpu.matmul %18, %19, %cst_14 {dimension_numbers = #tpu.dot_dimension_numbers<[1], [0], [0], [1], [0, 0, 1, 1], [], []>} : vector<64x128xf32>, vector<128x128xf32>, vector<64x128xf32> -> vector<64x128xf32>
    %21 = arith.addf %20, %12 : vector<64x128xf32>
    %22 = tpu.iota {dimensions = array<i32: 1>} : vector<8x64xi32>
    %23 = tpu.iota {dimensions = array<i32: 0>} : vector<8x64xi32>
    %c8_i32 = arith.constant 8 : i32
    %24 = vector.broadcast %c8_i32 : i32 to vector<8x64xi32>
    %25 = arith.muli %23, %24 : vector<8x64xi32>
    %26 = arith.cmpi eq, %22, %25 : vector<8x64xi32>
    %27 = arith.extui %26 : vector<8x64xi1> to vector<8x64xi32>
    %28 = arith.sitofp %27 : vector<8x64xi32> to vector<8x64xf32>
    %cst_15 = arith.constant dense<0.000000e+00> : vector<8x128xf32>
    %29 = tpu.matmul %28, %21, %cst_15 {dimension_numbers = #tpu.dot_dimension_numbers<[1], [0], [0], [1], [0, 0, 1, 1], [], []>} : vector<8x64xf32>, vector<64x128xf32>, vector<8x128xf32> -> vector<8x128xf32>
    %c0_16 = arith.constant 0 : index
    %c0_17 = arith.constant 0 : index
    %30 = vector.load %arg6[%c0_16, %c0_17] : memref<128x128xf32, #tpu.memory_space<vmem>>, vector<128x128xf32>
    %cst_18 = arith.constant dense<0.000000e+00> : vector<8x128xf32>
    %31 = tpu.matmul %29, %30, %cst_18 {dimension_numbers = #tpu.dot_dimension_numbers<[1], [0], [0], [1], [0, 0, 1, 1], [], []>} : vector<8x128xf32>, vector<128x128xf32>, vector<8x128xf32> -> vector<8x128xf32>
    %32 = vector.broadcast %2 : vector<1x128xf32> to vector<8x128xf32>
    %33 = arith.addf %31, %32 : vector<8x128xf32>
    %c0_19 = arith.constant 0 : index
    %c0_20 = arith.constant 0 : index
    %34 = vector.load %arg8[%c0_19, %c0_20] : memref<8x128xf32, #tpu.memory_space<vmem>>, vector<8x128xf32>
    tpu.vector_store %arg8[%c0_19, %c0_20], %33 {strides = array<i32>} : memref<8x128xf32, #tpu.memory_space<vmem>>, vector<8x128xf32>,
    return
  }
  func.func @transform_0(%arg0: i32) -> (i32, i32) {
    %c0_i32 = arith.constant 0 : i32
    %c0_i32_0 = arith.constant 0 : i32
    return %arg0, %c0_i32 : i32, i32
  }
  func.func @transform_1(%arg0: i32) -> (i32, i32) {
    %c0_i32 = arith.constant 0 : i32
    %c0_i32_0 = arith.constant 0 : i32
    return %arg0, %c0_i32 : i32, i32
  }
  func.func @transform_2(%arg0: i32) -> (i32, i32) {
    %c0_i32 = arith.constant 0 : i32
    %c0_i32_0 = arith.constant 0 : i32
    %c0_i32_1 = arith.constant 0 : i32
    return %c0_i32, %c0_i32_0 : i32, i32
  }
  func.func @transform_3(%arg0: i32) -> (i32, i32) {
    %c0_i32 = arith.constant 0 : i32
    %c0_i32_0 = arith.constant 0 : i32
    %c0_i32_1 = arith.constant 0 : i32
    return %c0_i32, %c0_i32_0 : i32, i32
  }
  func.func @transform_4(%arg0: i32) -> (i32, i32) {
    %c0_i32 = arith.constant 0 : i32
    %c0_i32_0 = arith.constant 0 : i32
    %c0_i32_1 = arith.constant 0 : i32
    return %c0_i32, %c0_i32_0 : i32, i32
  }
  func.func @transform_5(%arg0: i32) -> (i32, i32) {
    %c0_i32 = arith.constant 0 : i32
    %c0_i32_0 = arith.constant 0 : i32
    %c0_i32_1 = arith.constant 0 : i32
    return %c0_i32, %c0_i32_0 : i32, i32
  }
  func.func @transform_6(%arg0: i32) -> (i32, i32) {
    %c0_i32 = arith.constant 0 : i32
    %c0_i32_0 = arith.constant 0 : i32
    %c0_i32_1 = arith.constant 0 : i32
    return %c0_i32, %c0_i32_0 : i32, i32
  }
  func.func @transform_7(%arg0: i32) -> (i32, i32) {
    %c0_i32 = arith.constant 0 : i32
    %c0_i32_0 = arith.constant 0 : i32
    return %arg0, %c0_i32 : i32, i32
  }
}

</mosaic_0001>

<bundles_post_ra>
// kernel: _fused_forward.1
= control target key start
LH: loop header
LB: loop body
LE: loop exit
PB: predicated region body
PF: predicated region fallthrough
CT: control target
= control target key end

     0   :  { %12 = vsyncpa [#allocation3], 0  ;;  %s773_s0 = inlined_call_operand.vmem [shape: f32[64,128], index: 0, kind: input, shape index: {}]   ;;  %s774_s1 = inlined_call_operand.vmem [shape: s32[64,1], index: 1, kind: input, shape index: {}]   ;;  %s775_s2 = inlined_call_operand.hbm [shape: f32[128,128], index: 2, kind: input, shape index: {}]   ;;  %s776_s3 = inlined_call_operand.hbm [shape: f32[128,128], index: 3, kind: input, shape index: {}]   ;;  %s777_s4 = inlined_call_operand.hbm [shape: f32[128,128], index: 4, kind: input, shape index: {}]   ;;  %s778_s5 = inlined_call_operand.hbm [shape: f32[128,128], index: 5, kind: input, shape index: {}]   ;;  %s779_s6 = inlined_call_operand.hbm [shape: f32[8,128], index: 6, kind: input, shape index: {}]   ;;  %s780_s7 = inlined_call_operand.hbm [shape: f32[8,128], index: 7, kind: output, shape index: {}]  }
   0x1   :  { %13 = vsyncpa [#allocation6], 0 }
   0x2   :  { %14 = vsyncpa [#allocation9], 0 }
   0x3   :  { %15 = vsyncpa [#allocation4], 0  ;;  %s37_s26 = sshll.u32 %s776_s3, 4  ;;  %s643_s27 = smov [#allocation5]   ;;  %s38_s26 = int_to_ptr.hbm [resolvable:$true] %s37_s26 }
   0x4   :  { %s39_s28 = sshll.u32 %s643_s27, 4  ;;  %s63_s8 = sshll.u32 %s778_s5, 4  ;;  %s40_s28 = int_to_ptr.vmem [resolvable:$true] %s39_s28  ;;  %s64_s8 = int_to_ptr.hbm [resolvable:$true] %s63_s8 }
   0x5   :  { %s644_s9 = smov 128   ;;  %s645_s10 = smov 8  }
   0x6   :  { %45 = dma.hbm_to_vmem [thread:$0]  %s38_s26, 2048, %s40_s28, [#allocation6], %s644_s9, %s644_s9, %s645_s10  }
   0x7   :  { %s646_s11 = smov [#allocation8]   ;;  %s24_s15 = sshll.u32 %s775_s2, 4  ;;  %s25_s15 = int_to_ptr.hbm [resolvable:$true] %s24_s15 }
   0x8   :  { %s65_s12 = sshll.u32 %s646_s11, 4  ;;  %s50_s17 = sshll.u32 %s777_s4, 4  ;;  %s66_s12 = int_to_ptr.vmem [resolvable:$true] %s65_s12  ;;  %s51_s17 = int_to_ptr.hbm [resolvable:$true] %s50_s17 }
   0x9   :  { %71 = dma.hbm_to_vmem [thread:$0]  %s64_s8, 2048, %s66_s12, [#allocation9], %s644_s9, %s644_s9, %s645_s10  }
   0xa   :  { %s647_s18 = smov [#allocation2]   ;;  %s648_s5 = smov [#allocation7]  }
   0xb   :  { %s26_s19 = sshll.u32 %s647_s18, 4  ;;  %s52_s20 = sshll.u32 %s648_s5, 4  ;;  %s27_s19 = int_to_ptr.vmem [resolvable:$true] %s26_s19  ;;  %s53_s20 = int_to_ptr.vmem [resolvable:$true] %s52_s20 }
   0xc   :  { %32 = dma.hbm_to_vmem [thread:$0]  %s25_s15, 2048, %s27_s19, [#allocation3], %s644_s9, %s644_s9, %s645_s10  }
   0xd   :  { %s77_s23 = sshll.u32 %s779_s6, 4  ;;  %s649_s2 = smov [#allocation10]   ;;  %s78_s23 = int_to_ptr.hbm [resolvable:$true] %s77_s23 }
   0xe   :  { %58 = dma.hbm_to_vmem [thread:$0]  %s51_s17, 2048, %s53_s20, [#allocation6], %s644_s9, %s644_s9, %s645_s10  }
   0xf   :  { %s79_s24 = sshll.u32 %s649_s2, 4  ;;  %s80_s24 = int_to_ptr.vmem [resolvable:$true] %s79_s24 }
  0x10   :  { %82 = dma.hbm_to_vmem [thread:$0]  %s78_s23, 128, %s80_s24, [#allocation9]  }
  0x11   :  { %635 = dma.done.wait [#allocation3], 2048  }
  0x12   :  { %636 = vsyncadd [#allocation3], 4294965248 }
  0x13   :  { %637 = dma.done.wait [#allocation6], 4096  }
  0x14   :  { %638 = vsyncadd [#allocation6], 4294963200 }
  0x15   :  { %639 = dma.done.wait [#allocation9], 2176  }
  0x16   :  { %640 = vsyncadd [#allocation9], 4294965120  ;;  %v650_v0 = vmov 0   ;;  %v238_v1 = vld [vmem:[%s774_s1] sm:$0xff]  ;;  %v129_v2 = vld [vmem:[#allocation2 + $0x78] sm:$0xff]  ;;  %v246_v52 = vlaneseq  ;;  %v651_v59 = vmov 1.0  }
  0x17   :  { %469 = vset.pattern.permute.xlu0 %v650_v0  ;;  %470 = vset.pattern.permute.xlu1 %v650_v0  ;;  %v128_v3 = vld [vmem:[#allocation2 + $0x70] sm:$0xff]  ;;  %v127_v4 = vld [vmem:[#allocation2 + $0x68] sm:$0xff]  ;;  %v126_v6 = vld [vmem:[#allocation2 + $0x60] sm:$0xff]  ;;  %vm359_vm9 = vcmask 523264   ;;  %s428_s29 = sshll.u32 %s780_s7, 4  ;;  %s429_s29 = int_to_ptr.hbm [resolvable:$true] %s428_s29 }
  0x18   :  { %471 = vset.pattern.permute.xlu2 %v650_v0  ;;  %249 = vperm.xlu0 %469, %v238_v1   ;;  %v240_v5 = vld [vmem:[%s774_s1 + $0x10] sm:$0xff]  ;;  %v239_v7 = vld [vmem:[%s774_s1 + $0x8] sm:$0xff]  ;;  %v125_v8 = vld [vmem:[#allocation2 + $0x58] sm:$0xff]  ;;  %v758_v56 = vand.u32 127, %v246_v52 }
  0x19   :  { %131 = vmatpush.msra.mxu0 %v129_v2  ;;  %255 = vperm.xlu1 %470, %v240_v5   ;;  %v124_v9 = vld [vmem:[#allocation2 + $0x50] sm:$0xff]  ;;  %v241_v10 = vld [vmem:[%s774_s1 + $0x18] sm:$0xff]  ;;  %v123_v11 = vld [vmem:[#allocation2 + $0x48] sm:$0xff] }
  0x1a   :  { %v122_v12 = vld [vmem:[#allocation2 + $0x40] sm:$0xff]  ;;  %v121_v13 = vld [vmem:[#allocation2 + $0x38] sm:$0xff]  ;;  %v244_v14 = vld [vmem:[%s774_s1 + $0x30] sm:$0xff] }
  0x1b   :  { %132 = vmatpush.msra.mxu0 %v128_v3  ;;  %v120_v15 = vld [vmem:[#allocation2 + $0x30] sm:$0xff]  ;;  %v119_v16 = vld [vmem:[#allocation2 + $0x28] sm:$0xff]  ;;  %v118_v17 = vld [vmem:[#allocation2 + $0x20] sm:$0xff] }
  0x1c   :  { %v117_v18 = vld [vmem:[#allocation2 + $0x18] sm:$0xff]  ;;  %v116_v19 = vld [vmem:[#allocation2 + $0x10] sm:$0xff]  ;;  %v242_v20 = vld [vmem:[%s774_s1 + $0x20] sm:$0xff] }
  0x1d   :  { %133 = vmatpush.msra.mxu0 %v127_v4  ;;  %v245_v21 = vld [vmem:[%s774_s1 + $0x38] sm:$0xff]  ;;  %261 = vperm.xlu2 %471, %v242_v20   ;;  %v115_v22 = vld [vmem:[#allocation2 + $0x8] sm:$0xff]  ;;  %v114_v23 = vld [vmem:[#allocation2] sm:$0xff] }
  0x1e   :  { %v106_v24 = vld [vmem:[%s773_s0] sm:$0xff]  ;;  %v243_v25 = vld [vmem:[%s774_s1 + $0x28] sm:$0xff]  ;;  %v108_v27 = vld [vmem:[%s773_s0 + $0x10] sm:$0xff] }
  0x1f   :  { %134 = vmatpush.msra.mxu0 %v126_v6  ;;  %v107_v26 = vld [vmem:[%s773_s0 + $0x8] sm:$0xff]  ;;  %v311_v28 = vld [vmem:[#allocation7 + $0x78] sm:$0xff]  ;;  %v310_v30 = vld [vmem:[#allocation7 + $0x70] sm:$0xff] }
  0x20   :  { %252 = vperm.xlu0 %469, %v239_v7   ;;  %312 = vmatpush.msra.mxu2 %v311_v28  ;;  %v109_v29 = vld [vmem:[%s773_s0 + $0x18] sm:$0xff]  ;;  %v309_v31 = vld [vmem:[#allocation7 + $0x68] sm:$0xff]  ;;  %v308_v32 = vld [vmem:[#allocation7 + $0x60] sm:$0xff] }
  0x21   :  { %135 = vmatpush.msra.mxu0 %v125_v8  ;;  %258 = vperm.xlu1 %470, %v241_v10   ;;  %v307_v33 = vld [vmem:[#allocation7 + $0x58] sm:$0xff]  ;;  %v110_v34 = vld [vmem:[%s773_s0 + $0x20] sm:$0xff]  ;;  %v306_v35 = vld [vmem:[#allocation7 + $0x50] sm:$0xff] }
  0x22   :  { %313 = vmatpush.msra.mxu2 %v310_v30  ;;  %v305_v36 = vld [vmem:[#allocation7 + $0x48] sm:$0xff]  ;;  %v304_v37 = vld [vmem:[#allocation7 + $0x40] sm:$0xff]  ;;  %v303_v38 = vld [vmem:[#allocation7 + $0x38] sm:$0xff] }
  0x23   :  { %136 = vmatpush.msra.mxu0 %v124_v9  ;;  %v111_v39 = vld [vmem:[%s773_s0 + $0x28] sm:$0xff]  ;;  %v302_v40 = vld [vmem:[#allocation7 + $0x30] sm:$0xff]  ;;  %v300_v42 = vld [vmem:[#allocation7 + $0x20] sm:$0xff] }
  0x24   :  { %314 = vmatpush.msra.mxu2 %v309_v31  ;;  %v301_v41 = vld [vmem:[#allocation7 + $0x28] sm:$0xff]  ;;  %v299_v43 = vld [vmem:[#allocation7 + $0x18] sm:$0xff]  ;;  %v112_v44 = vld [vmem:[%s773_s0 + $0x30] sm:$0xff] }
  0x25   :  { %137 = vmatpush.msra.mxu0 %v123_v11  ;;  %264 = vperm.xlu2 %471, %v243_v25   ;;  %v298_v45 = vld [vmem:[#allocation7 + $0x10] sm:$0xff]  ;;  %v297_v46 = vld [vmem:[#allocation7 + $0x8] sm:$0xff]  ;;  %v296_v47 = vld [vmem:[#allocation7] sm:$0xff] }
  0x26   :  { %315 = vmatpush.msra.mxu2 %v308_v32  ;;  %v113_v48 = vld [vmem:[%s773_s0 + $0x38] sm:$0xff]  ;;  %v194_v50 = vld [vmem:[#allocation5 + $0x70] sm:$0xff]  ;;  %v193_v51 = vld [vmem:[#allocation5 + $0x68] sm:$0xff]  ;;  %s653_s0 = smov [#allocation11]  }
  0x27   :  { %138 = vmatpush.msra.mxu0 %v122_v12  ;;  %v195_v49 = vld [vmem:[#allocation5 + $0x78] sm:$0xff]  ;;  %v192_v53 = vld [vmem:[#allocation5 + $0x60] sm:$0xff]  ;;  %v190_v55 = vld [vmem:[#allocation5 + $0x50] sm:$0xff]  ;;  %s426_s26 = sshll.u32 %s653_s0, 4  ;;  %s427_s26 = int_to_ptr.vmem [resolvable:$true] %s426_s26 }
  0x28   :  { %267 = vperm.xlu0 %469, %v244_v14   ;;  %316 = vmatpush.msra.mxu2 %v307_v33  ;;  %v191_v54 = vld [vmem:[#allocation5 + $0x58] sm:$0xff]  ;;  %v189_v57 = vld [vmem:[#allocation5 + $0x48] sm:$0xff]  ;;  %v188_v60 = vld [vmem:[#allocation5 + $0x40] sm:$0xff] }
  0x29   :  { %139 = vmatpush.msra.mxu0 %v121_v13  ;;  %270 = vperm.xlu1 %470, %v245_v21   ;;  %v187_v61 = vld [vmem:[#allocation5 + $0x38] sm:$0xff]  ;;  %v186_v62 = vld [vmem:[#allocation5 + $0x30] sm:$0xff]  ;;  %v185_v63 = vld [vmem:[#allocation5 + $0x28] sm:$0xff] }
  0x2a   :  { %317 = vmatpush.msra.mxu2 %v306_v35  ;;  %197 = vmatpush.msra.mxu1 %v195_v49  ;;  %v184_v2 = vld [vmem:[#allocation5 + $0x20] sm:$0xff]  ;;  %v183_v3 = vld [vmem:[#allocation5 + $0x18] sm:$0xff]  ;;  %v182_v4 = vld [vmem:[#allocation5 + $0x10] sm:$0xff] }
  0x2b   :  { %140 = vmatpush.msra.mxu0 %v120_v15  ;;  %v181_v5 = vld [vmem:[#allocation5 + $0x8] sm:$0xff]  ;;  %v180_v6 = vld [vmem:[#allocation5] sm:$0xff] }
  0x2c   :  { %318 = vmatpush.msra.mxu2 %v305_v36  ;;  %198 = vmatpush.msra.mxu1 %v194_v50  ;;  %v472_v10 = vld [vmem:[#allocation10] ss:$0 sm:$0xff] }
  0x2d   :  { %141 = vmatpush.msra.mxu0 %v119_v16 }
  0x2e   :  { %319 = vmatpush.msra.mxu2 %v304_v37  ;;  %199 = vmatpush.msra.mxu1 %v193_v51 }
  0x2f   :  { %142 = vmatpush.msra.mxu0 %v118_v17 }
  0x30   :  { %320 = vmatpush.msra.mxu2 %v303_v38  ;;  %200 = vmatpush.msra.mxu1 %v192_v53  ;;  %v473_v38 = vld [vmem:[#allocation10 + $0x1] ss:$0 sm:$0xff] }
  0x31   :  { %143 = vmatpush.msra.mxu0 %v117_v18 }
  0x32   :  { %321 = vmatpush.msra.mxu2 %v302_v40  ;;  %201 = vmatpush.msra.mxu1 %v191_v54 }
  0x33   :  { %144 = vmatpush.msra.mxu0 %v116_v19 }
  0x34   :  { %322 = vmatpush.msra.mxu2 %v301_v41  ;;  %202 = vmatpush.msra.mxu1 %v190_v55 }
  0x35   :  { %145 = vmatpush.msra.mxu0 %v115_v22 }
  0x36   :  { %323 = vmatpush.msra.mxu2 %v300_v42  ;;  %203 = vmatpush.msra.mxu1 %v189_v57 }
  0x37   :  { %146 = vmatpush.msra.mxu0 %v114_v23 }
  0x38   :  { %147 = vmatmul.f32.vlgmr.msra.gmra.mxu0 %v106_v24  ;;  %324 = vmatpush.msra.mxu2 %v299_v43 }
  0x39   :  { %204 = vmatpush.msra.mxu1 %v188_v60 }
  0x3a   :  { %325 = vmatpush.msra.mxu2 %v298_v45 }
  0x3b   :  { %205 = vmatpush.msra.mxu1 %v187_v61 }
  0x3c   :  { %326 = vmatpush.msra.mxu2 %v297_v46 }
  0x3d   :  { %206 = vmatpush.msra.mxu1 %v186_v62 }
  0x3e   :  { %327 = vmatpush.msra.mxu2 %v296_v47 }
  0x3f   :  { %207 = vmatpush.msra.mxu1 %v185_v63 }
  0x40   :  { %150 = vmatmul.f32.gmra.mxu0 %v107_v26 }
  0x41   :  { %208 = vmatpush.msra.mxu1 %v184_v2 }
  0x43   :  { %209 = vmatpush.msra.mxu1 %v183_v3 }
  0x45   :  { %210 = vmatpush.msra.mxu1 %v182_v4 }
  0x47   :  { %211 = vmatpush.msra.mxu1 %v181_v5 }
  0x48   :  { %153 = vmatmul.f32.gmra.mxu0 %v108_v27 }
  0x49   :  { %212 = vmatpush.msra.mxu1 %v180_v6 }
  0x50   :  { %156 = vmatmul.f32.gmra.mxu0 %v109_v29 }
  0x58   :  { %159 = vmatmul.f32.gmra.mxu0 %v110_v34 }
  0x60   :  { %162 = vmatmul.f32.gmra.mxu0 %v111_v39 }
  0x68   :  { %165 = vmatmul.f32.gmra.mxu0 %v112_v44 }
  0x70   :  { %168 = vmatmul.f32.gmra.mxu0 %v113_v48 }
  0x77   :  { %v262_v8 = vpop.permute.xlu2 %261 }
  0x78   :  { %vm276_vm4 = vcmp.eq.s32.totalorder %v758_v56, %v262_v8 }
  0x7f   :  { %v265_v9 = vpop.permute.xlu2 %264 }
  0x80   :  { %vm277_vm5 = vcmp.eq.s32.totalorder %v758_v56, %v265_v9 }
  0x8a   :  { %v250_v58 = vpop.permute.xlu0 %249 }
  0x8b   :  { %vm272_vm0 = vcmp.eq.s32.totalorder %v758_v56, %v250_v58  ;;  %v256_v1 = vpop.permute.xlu1 %255 }
  0x8c   :  { %448 = vmatmul.msk.f32.vlgmr.msra.gmra.mxu2 %vm272_vm0, %v651_v59  ;;  %vm274_vm2 = vcmp.eq.s32.totalorder %v758_v56, %v256_v1 }
  0x92   :  { %v253_v0 = vpop.permute.xlu0 %252 }
  0x93   :  { %vm273_vm1 = vcmp.eq.s32.totalorder %v758_v56, %v253_v0  ;;  %v259_v7 = vpop.permute.xlu1 %258  ;;  %v354_v0 = vshrl.u32 %v246_v52, 7  ;;  %v398_v52 = vld [vmem:[#allocation8 + $0x78] sm:$0xff] }
  0x94   :  { %449 = vmatmul.msk.f32.gmra.mxu2 %vm273_vm1, %v651_v59  ;;  %vm275_vm3 = vcmp.eq.s32.totalorder %v758_v56, %v259_v7 }
  0x95   :  { %v355_v5 = vmul.u32 8, %v354_v0 }
  0x97   :  { %vm356_vm8 = vcmp.eq.s32.totalorder %v758_v56, %v355_v5 }
  0x9a   :  { %v268_v13 = vpop.permute.xlu0 %267 }
  0x9b   :  { %vm278_vm6 = vcmp.eq.s32.totalorder %v758_v56, %v268_v13  ;;  %v271_v17 = vpop.permute.xlu1 %270  ;;  %v396_v13 = vld [vmem:[#allocation8 + $0x68] sm:$0xff] }
  0x9c   :  { %450 = vmatmul.msk.f32.gmra.mxu2 %vm274_vm2, %v651_v59  ;;  %vm279_vm7 = vcmp.eq.s32.totalorder %v758_v56, %v271_v17  ;;  %v392_v56 = vld [vmem:[#allocation8 + $0x48] sm:$0xff]  ;;  %v391_v17 = vld [vmem:[#allocation8 + $0x40] sm:$0xff] }
  0xa4   :  { %451 = vmatmul.msk.f32.gmra.mxu2 %vm275_vm3, %v651_v59 }
  0xac   :  { %452 = vmatmul.msk.f32.gmra.mxu2 %vm276_vm4, %v651_v59 }
  0xb4   :  { %453 = vmatmul.msk.f32.gmra.mxu2 %vm277_vm5, %v651_v59 }
  0xb5   :  { %v148_v11 = vpop.f32.mrf.mxu0 }
  0xb6   :  { %v149_v12 = vadd.f32 %v472_v10, %v148_v11 }
  0xb8   :  { %475 = vtanh.f32 %v149_v12  ;;  %v397_v12 = vld [vmem:[#allocation8 + $0x70] sm:$0xff] }
  0xbc   :  { %454 = vmatmul.msk.f32.gmra.mxu2 %vm278_vm6, %v651_v59 }
  0xbd   :  { %v151_v14 = vpop.f32.mrf.mxu0 }
  0xbe   :  { %v476_v15 = vpop.eup %475  ;;  %v152_v16 = vadd.f32 %v472_v10, %v151_v14  ;;  %v395_v14 = vld [vmem:[#allocation8 + $0x60] sm:$0xff] }
  0xbf   :  { %213 = vmatmul.f32.vlgmr.msra.gmra.mxu1 %v476_v15  ;;  %v394_v15 = vld [vmem:[#allocation8 + $0x58] sm:$0xff] }
  0xc0   :  { %477 = vtanh.f32 %v152_v16  ;;  %v393_v16 = vld [vmem:[#allocation8 + $0x50] sm:$0xff] }
  0xc4   :  { %455 = vmatmul.msk.f32.gmra.mxu2 %vm279_vm7, %v651_v59 }
  0xc5   :  { %v154_v18 = vpop.f32.mrf.mxu0 }
  0xc6   :  { %v478_v19 = vpop.eup %477  ;;  %v155_v20 = vadd.f32 %v472_v10, %v154_v18  ;;  %v390_v18 = vld [vmem:[#allocation8 + $0x38] sm:$0xff] }
  0xc7   :  { %216 = vmatmul.f32.gmra.mxu1 %v478_v19  ;;  %v389_v19 = vld [vmem:[#allocation8 + $0x30] sm:$0xff] }
  0xc8   :  { %479 = vtanh.f32 %v155_v20  ;;  %v388_v20 = vld [vmem:[#allocation8 + $0x28] sm:$0xff] }
  0xcd   :  { %v157_v21 = vpop.f32.mrf.mxu0 }
  0xce   :  { %v480_v22 = vpop.eup %479  ;;  %v158_v23 = vadd.f32 %v472_v10, %v157_v21  ;;  %v387_v21 = vld [vmem:[#allocation8 + $0x20] sm:$0xff] }
  0xcf   :  { %219 = vmatmul.f32.gmra.mxu1 %v480_v22  ;;  %v386_v22 = vld [vmem:[#allocation8 + $0x18] sm:$0xff] }
  0xd0   :  { %481 = vtanh.f32 %v158_v23  ;;  %v385_v23 = vld [vmem:[#allocation8 + $0x10] sm:$0xff] }
  0xd5   :  { %v160_v24 = vpop.f32.mrf.mxu0 }
  0xd6   :  { %v482_v25 = vpop.eup %481  ;;  %v161_v26 = vadd.f32 %v472_v10, %v160_v24  ;;  %v384_v24 = vld [vmem:[#allocation8 + $0x8] sm:$0xff] }
  0xd7   :  { %222 = vmatmul.f32.gmra.mxu1 %v482_v25  ;;  %v383_v25 = vld [vmem:[#allocation8] sm:$0xff] }
  0xd8   :  { %483 = vtanh.f32 %v161_v26 }
  0xdd   :  { %v163_v27 = vpop.f32.mrf.mxu0 }
  0xde   :  { %v484_v28 = vpop.eup %483  ;;  %v164_v29 = vadd.f32 %v472_v10, %v163_v27  ;;  %v474_v27 = vld [vmem:[#allocation10 + $0x2] ss:$0 sm:$0xff] }
  0xdf   :  { %225 = vmatmul.f32.gmra.mxu1 %v484_v28 }
  0xe0   :  { %485 = vtanh.f32 %v164_v29 }
  0xe5   :  { %v166_v30 = vpop.f32.mrf.mxu0 }
  0xe6   :  { %v486_v31 = vpop.eup %485  ;;  %v167_v32 = vadd.f32 %v472_v10, %v166_v30 }
  0xe7   :  { %228 = vmatmul.f32.gmra.mxu1 %v486_v31 }
  0xe8   :  { %487 = vtanh.f32 %v167_v32 }
  0xed   :  { %v169_v33 = vpop.f32.mrf.mxu0 }
  0xee   :  { %v488_v34 = vpop.eup %487  ;;  %v170_v35 = vadd.f32 %v472_v10, %v169_v33  ;;  %v652_v10 = vmov 0.0  }
  0xef   :  { %231 = vmatmul.f32.gmra.mxu1 %v488_v34  ;;  %v456_v11 = vsel %vm356_vm8, 1.0, %v652_v10 }
  0xf0   :  { %489 = vtanh.f32 %v170_v35 }
  0xf6   :  { %v490_v36 = vpop.eup %489 }
  0xf7   :  { %234 = vmatmul.f32.gmra.mxu1 %v490_v36 }
 0x10f   :  { %v329_v37 = vpop.f32.mrf.mxu2 }
 0x117   :  { %v332_v39 = vpop.f32.mrf.mxu2 }
 0x11f   :  { %v335_v44 = vpop.f32.mrf.mxu2 }
 0x127   :  { %v338_v46 = vpop.f32.mrf.mxu2 }
 0x12f   :  { %v341_v48 = vpop.f32.mrf.mxu2 }
 0x137   :  { %v344_v50 = vpop.f32.mrf.mxu2 }
 0x13c   :  { %v214_v40 = vpop.f32.mrf.mxu1 }
 0x13d   :  { %v215_v41 = vadd.f32 %v473_v38, %v214_v40 }
 0x13f   :  { %v330_v42 = vadd.f32 %v329_v37, %v215_v41  ;;  %v347_v54 = vpop.f32.mrf.mxu2 }
 0x144   :  { %v217_v43 = vpop.f32.mrf.mxu1 }
 0x145   :  { %v218_v6 = vadd.f32 %v473_v38, %v217_v43 }
 0x147   :  { %v350_v59 = vpop.f32.mrf.mxu2  ;;  %v333_v9 = vadd.f32 %v332_v39, %v218_v6 }
 0x14c   :  { %v220_v45 = vpop.f32.mrf.mxu1 }
 0x14d   :  { %v221_v3 = vadd.f32 %v473_v38, %v220_v45 }
 0x14f   :  { %v336_v8 = vadd.f32 %v335_v44, %v221_v3 }
 0x154   :  { %v223_v47 = vpop.f32.mrf.mxu1 }
 0x155   :  { %v224_v1 = vadd.f32 %v473_v38, %v223_v47 }
 0x157   :  { %v339_v7 = vadd.f32 %v338_v46, %v224_v1 }
 0x15c   :  { %v226_v49 = vpop.f32.mrf.mxu1 }
 0x15d   :  { %v227_v62 = vadd.f32 %v473_v38, %v226_v49 }
 0x15f   :  { %v342_v4 = vadd.f32 %v341_v48, %v227_v62 }
 0x164   :  { %v229_v51 = vpop.f32.mrf.mxu1 }
 0x165   :  { %v230_v60 = vadd.f32 %v473_v38, %v229_v51 }
 0x167   :  { %v345_v2 = vadd.f32 %v344_v50, %v230_v60 }
 0x16c   :  { %v232_v53 = vpop.f32.mrf.mxu1 }
 0x16d   :  { %v233_v57 = vadd.f32 %v473_v38, %v232_v53 }
 0x16f   :  { %v348_v63 = vadd.f32 %v347_v54, %v233_v57 }
 0x174   :  { %v235_v55 = vpop.f32.mrf.mxu1 }
 0x175   :  { %v236_v58 = vadd.f32 %v473_v38, %v235_v55 }
 0x177   :  { %v351_v61 = vadd.f32 %v350_v59, %v236_v58 }
 0x179   :  { %371 = vmatpush.msra.mxu3 %v351_v61 }
 0x17b   :  { %372 = vmatpush.msra.mxu3 %v348_v63 }
 0x17d   :  { %373 = vmatpush.msra.mxu3 %v345_v2 }
 0x17f   :  { %374 = vmatpush.msra.mxu3 %v342_v4 }
 0x181   :  { %375 = vmatpush.msra.mxu3 %v339_v7 }
 0x183   :  { %376 = vmatpush.msra.mxu3 %v336_v8 }
 0x185   :  { %377 = vmatpush.msra.mxu3 %v333_v9 }
 0x187   :  { %378 = vmatpush.msra.mxu3 %v330_v42 }
 0x188   :  { %457 = vmatmul.msk.f32.vlgmr.msra.gmra.mxu3 %vm359_vm9, %v456_v11 }
 0x189   :  { %400 = vmatpush.msrb.mxu3 %v398_v52 }
 0x18b   :  { %401 = vmatpush.msrb.mxu3 %v397_v12 }
 0x18d   :  { %402 = vmatpush.msrb.mxu3 %v396_v13 }
 0x18f   :  { %403 = vmatpush.msrb.mxu3 %v395_v14 }
 0x191   :  { %404 = vmatpush.msrb.mxu3 %v394_v15 }
 0x193   :  { %405 = vmatpush.msrb.mxu3 %v393_v16 }
 0x195   :  { %406 = vmatpush.msrb.mxu3 %v392_v56 }
 0x197   :  { %407 = vmatpush.msrb.mxu3 %v391_v17 }
 0x199   :  { %408 = vmatpush.msrb.mxu3 %v390_v18 }
 0x19b   :  { %409 = vmatpush.msrb.mxu3 %v389_v19 }
 0x19d   :  { %410 = vmatpush.msrb.mxu3 %v388_v20 }
 0x19f   :  { %411 = vmatpush.msrb.mxu3 %v387_v21 }
 0x1a1   :  { %412 = vmatpush.msrb.mxu3 %v386_v22 }
 0x1a3   :  { %413 = vmatpush.msrb.mxu3 %v385_v23 }
 0x1a5   :  { %414 = vmatpush.msrb.mxu3 %v384_v24 }
 0x1a7   :  { %415 = vmatpush.msrb.mxu3 %v383_v25 }
 0x20b   :  { %v380_v26 = vpop.f32.mrf.mxu3 }
 0x20c   :  { %416 = vmatmul.f32.vlgmr.msrb.gmra.mxu3 %v380_v26 }
 0x28f   :  { %v417_v28 = vpop.f32.mrf.mxu3 }
 0x290   :  { %v418_v29 = vadd.f32 %v474_v27, %v417_v28 }
 0x292   :  { %420 = vst [vmem:[#allocation11] sm:$0xff] %v418_v29 }
 0x293   :  { %431 = dma.vmem_to_hbm [thread:$0]  %s427_s26, 128, %s429_s29, [#allocation4]  }
 0x294   :  { %641 = dma.done.wait [#allocation4], 128  }
 0x295   :  { %642 = vsyncadd [#allocation4], 4294967168 }
 0x296   :  { %436 = vsyncpa [#allocation3], 1 }
 0x297   :  { %437 = vsyncpa [#allocation6], 1 }
 0x298   :  { %438 = vsyncpa [#allocation9], 1 }
 0x299   :  { %439 = vsyncpa [#allocation4], 1 }

</bundles_post_ra>
